<compile_context>
chip_gen: v6e
topology: v6e:2x2x1
jax: 0.10.0
libtpu: 0.0.40
codegen_flags: <defaults>
</compile_context>

<pallas_src>
import functools

import jax
import jax.numpy as jnp
from jax.experimental import pallas as pl
from jax.experimental.pallas import tpu as pltpu


def _round_up(n, m=8):
    return ((n + m - 1) // m) * m


# ---------------------------------------------------------------------------
# Kernel
# ---------------------------------------------------------------------------
def critic_kernel(s_ref, a_ref, w_ref, b_ref, out_ref, *,
                  state_dim, action_dim, sd_pad, ad_pad, hidden):
    """Fused twin-Q forward.

    w_ref row layout (all offsets are multiples of 8 -> aligned ref slices):
      [0, state_dim)            : layer-1 weights, state part   (sd, 2H)
      [sd_pad, sd_pad+action_d) : layer-1 weights, action part  (ad, 2H)
      [o2, o2+2H)               : block_diag(w12, w22)          (2H, 2H)
      [o3, o3+2H)               : block_diag(w13, w23)          (2H, 2H)
      [o4, o4+2H)               : layer-4, cols 0/1 used        (2H, 2H)
    b_ref rows 0..3 = fused biases of layers 1..4 (float32).
    """
    H2 = 2 * hidden
    o2 = sd_pad + ad_pad
    o3 = o2 + H2
    o4 = o3 + H2

    cdt = w_ref.dtype                      # f32 (default) or bf16 on v6e/v7x
    s = s_ref[...].astype(cdt)
    a = a_ref[...].astype(cdt)
    b = b_ref[...]                         # (4, 2H) float32

    # Layer 1: split matmul replaces torch.cat([state, action], dim=1).
    h = (jnp.dot(s, w_ref[0:state_dim, :], preferred_element_type=jnp.float32)
         + jnp.dot(a, w_ref[sd_pad:sd_pad + action_dim, :],
                   preferred_element_type=jnp.float32)
         + b[0:1, :])
    h = jnp.maximum(h, 0.0)

    # Layers 2-3: block-diagonal weights keep the two towers independent.
    h = jnp.maximum(
        jnp.dot(h.astype(cdt), w_ref[o2:o3, :],
                preferred_element_type=jnp.float32) + b[1:2, :], 0.0)
    h = jnp.maximum(
        jnp.dot(h.astype(cdt), w_ref[o3:o4, :],
                preferred_element_type=jnp.float32) + b[2:3, :], 0.0)

    # Layer 4: only columns 0 (q1) and 1 (q2) are nonzero.
    q = jnp.dot(h.astype(cdt), w_ref[o4:o4 + H2, :],
                preferred_element_type=jnp.float32) + b[3:4, :]

    out_ref[...] = q[:, 0:2]               # single lane-packed (B, 2) output


# ---------------------------------------------------------------------------
# Wrapper-side parameter packing (done once, outside the kernel)
# ---------------------------------------------------------------------------
def pack_critic_params(params1, params2, state_dim, action_dim, hidden,
                       weight_dtype=jnp.float32):
    """Fuse the twin towers and pack into one weight buffer + one bias buffer.

    Set weight_dtype=jnp.bfloat16 on v6e/v7x to halve MXU passes and weight
    DMA bytes (accumulation stays f32). Do NOT use int8 on v7x (fp8-only MXU).
    """
    w11, b11, w12, b12, w13, b13, w14, b14 = params1
    w21, b21, w22, b22, w23, b23, w24, b24 = params2
    H, H2 = hidden, 2 * hidden
    sd_pad = _round_up(state_dim)
    ad_pad = _round_up(action_dim)

    # Layer 1 fused lane-wise, then split rows into state / action parts.
    w1 = jnp.concatenate([w11, w21], axis=1)          # (sd+ad, 2H)
    w1s, w1a = w1[:state_dim], w1[state_dim:]
    b1 = jnp.concatenate([b11, b21], axis=1)

    def blkdiag(a_, b_):
        z1 = jnp.zeros((a_.shape[0], b_.shape[1]), a_.dtype)
        z2 = jnp.zeros((b_.shape[0], a_.shape[1]), b_.dtype)
        return jnp.concatenate(
            [jnp.concatenate([a_, z1], axis=1),
             jnp.concatenate([z2, b_], axis=1)], axis=0)

    w2 = blkdiag(w12, w22)
    b2 = jnp.concatenate([b12, b22], axis=1)
    w3 = blkdiag(w13, w23)
    b3 = jnp.concatenate([b13, b23], axis=1)

    # Layer 4 padded to 2H columns: col 0 <- tower1, col 1 <- tower2.
    w4 = jnp.zeros((H2, H2), jnp.float32)
    w4 = w4.at[:H, 0].set(w14[:, 0]).at[H:, 1].set(w24[:, 0])
    b4 = jnp.zeros((1, H2), jnp.float32)
    b4 = b4.at[0, 0].set(b14[0, 0]).at[0, 1].set(b24[0, 0])

    def padrows(x, rows):
        pad = rows - x.shape[0]
        if pad == 0:
            return x
        return jnp.concatenate(
            [x, jnp.zeros((pad, x.shape[1]), x.dtype)], axis=0)

    w_pack = jnp.concatenate(
        [padrows(w1s, sd_pad), padrows(w1a, ad_pad), w2, w3, w4],
        axis=0).astype(weight_dtype)                     # (sd_pad+ad_pad+3*2H, 2H)
    b_pack = jnp.concatenate([b1, b2, b3, b4], axis=0).astype(jnp.float32)
    return w_pack, b_pack


def critic_forward(state, action, w_pack, b_pack, *,
                   state_dim, action_dim, hidden):
    B = state.shape[0]
    H2 = 2 * hidden
    sd_pad = _round_up(state_dim)
    ad_pad = _round_up(action_dim)

    kernel = functools.partial(
        critic_kernel, state_dim=state_dim, action_dim=action_dim,
        sd_pad=sd_pad, ad_pad=ad_pad, hidden=hidden)

    flops = 2 * B * H2 * (state_dim + action_dim + 3 * H2)
    bytes_accessed = (
        (state.size + action.size) * 4
        + w_pack.size * jnp.dtype(w_pack.dtype).itemsize
        + b_pack.size * 4 + B * 2 * 4)

    q = pl.pallas_call(
        kernel,
        out_shape=jax.ShapeDtypeStruct((B, 2), jnp.float32),
        in_specs=[pl.BlockSpec(memory_space=pltpu.MemorySpace.VMEM)] * 4,
        out_specs=pl.BlockSpec(memory_space=pltpu.MemorySpace.VMEM),
        cost_estimate=pl.CostEstimate(
            flops=flops, transcendentals=0, bytes_accessed=bytes_accessed),
    )(state, action, w_pack, b_pack)

    return q[:, 0:1], q[:, 1:2]


# ---------------------------------------------------------------------------
# Init + pure-JAX reference (unfused, mirrors the PyTorch module)
# ---------------------------------------------------------------------------
def init_mlp_params(key, input_size, output_size, hidden_size, init_w=0.003):
    """Deterministic init mirroring the PyTorch MLP (last layer U(-init_w, init_w))."""
    ks = jax.random.split(key, 8)
    dims = [(input_size, hidden_size),
            (hidden_size, hidden_size),
            (hidden_size, hidden_size),
            (hidden_size, output_size)]
    params = []
    for i, (fan_in, fan_out) in enumerate(dims):
        bound = init_w if i == len(dims) - 1 else 1.0 / float(fan_in) ** 0.5
        w = jax.random.uniform(ks[2 * i], (fan_in, fan_out),
                               minval=-bound, maxval=bound, dtype=jnp.float32)
        b = jax.random.uniform(ks[2 * i + 1], (1, fan_out),
                               minval=-bound, maxval=bound, dtype=jnp.float32)
        params += [w, b]
    return params


def critic_reference(state, action, params1, params2):
    x = jnp.concatenate([state, action], axis=1)

    def mlp(x, p):
        w1, b1, w2, b2, w3, b3, w4, b4 = p
        h = jnp.maximum(x @ w1 + b1, 0.0)
        h = jnp.maximum(h @ w2 + b2, 0.0)
        h = jnp.maximum(h @ w3 + b3, 0.0)
        return h @ w4 + b4

    return mlp(x, params1), mlp(x, params2)


if __name__ == "__main__":
    B = 4
    state_dim = 24
    action_dim = 8
    input_size = state_dim + action_dim   # 32
    hidden_size = 32

    key = jax.random.PRNGKey(0)
    k_state, k_action, k_p1, k_p2 = jax.random.split(key, 4)

    state = jax.random.normal(k_state, (B, state_dim), dtype=jnp.float32)
    action = jax.random.normal(k_action, (B, action_dim), dtype=jnp.float32)

    params1 = init_mlp_params(k_p1, input_size, 1, hidden_size)
    params2 = init_mlp_params(k_p2, input_size, 1, hidden_size)

    # Pack once (use weight_dtype=jnp.bfloat16 on v6e/v7x for MXU-native path).
    w_pack, b_pack = pack_critic_params(
        params1, params2, state_dim, action_dim, hidden_size,
        weight_dtype=jnp.float32)

    q1, q2 = critic_forward(state, action, w_pack, b_pack,
                            state_dim=state_dim, action_dim=action_dim,
                            hidden=hidden_size)
    jax.block_until_ready((q1, q2))

    # Sanity-check against a pure-JAX reference of the original module.
    r1, r2 = critic_reference(state, action, params1, params2)
    assert q1.shape == (B, 1) and q2.shape == (B, 1)
    assert jnp.allclose(q1, r1, atol=1e-5, rtol=1e-5)
    assert jnp.allclose(q2, r2, atol=1e-5, rtol=1e-5)

    print("KERNEL_OK")
</pallas_src>

<mosaic_0001>
module attributes {stable_mosaic.version = 11 : i64} {
  func.func @critic_kernel(%arg0: memref<4x24xf32, #tpu.memory_space<vmem>>, %arg1: memref<4x8xf32, #tpu.memory_space<vmem>>, %arg2: memref<224x64xf32, #tpu.memory_space<vmem>>, %arg3: memref<4x64xf32, #tpu.memory_space<vmem>>, %arg4: memref<4x2xf32, #tpu.memory_space<vmem>>) attributes {dimension_semantics = [], scalar_prefetch = 0 : i64, scratch_operands = 0 : i64, tpu.core_type = #tpu.core_type<tc>} {
    %c0 = arith.constant 0 : index
    %c0_0 = arith.constant 0 : index
    %0 = vector.load %arg0[%c0, %c0_0] : memref<4x24xf32, #tpu.memory_space<vmem>>, vector<4x24xf32>
    %c0_1 = arith.constant 0 : index
    %c0_2 = arith.constant 0 : index
    %1 = vector.load %arg1[%c0_1, %c0_2] : memref<4x8xf32, #tpu.memory_space<vmem>>, vector<4x8xf32>
    %c0_3 = arith.constant 0 : index
    %c0_4 = arith.constant 0 : index
    %2 = vector.load %arg3[%c0_3, %c0_4] : memref<4x64xf32, #tpu.memory_space<vmem>>, vector<4x64xf32>
    %c0_5 = arith.constant 0 : index
    %c0_6 = arith.constant 0 : index
    %3 = vector.load %arg2[%c0_5, %c0_6] : memref<224x64xf32, #tpu.memory_space<vmem>>, vector<24x64xf32>
    %cst = arith.constant dense<0.000000e+00> : vector<4x64xf32>
    %4 = tpu.matmul %0, %3, %cst {dimension_numbers = #tpu.dot_dimension_numbers<[1], [0], [0], [1], [0, 0, 1, 1], [], []>} : vector<4x24xf32>, vector<24x64xf32>, vector<4x64xf32> -> vector<4x64xf32>
    %c24 = arith.constant 24 : index
    %c0_7 = arith.constant 0 : index
    %5 = vector.load %arg2[%c24, %c0_7] : memref<224x64xf32, #tpu.memory_space<vmem>>, vector<8x64xf32>
    %cst_8 = arith.constant dense<0.000000e+00> : vector<4x64xf32>
    %6 = tpu.matmul %1, %5, %cst_8 {dimension_numbers = #tpu.dot_dimension_numbers<[1], [0], [0], [1], [0, 0, 1, 1], [], []>} : vector<4x8xf32>, vector<8x64xf32>, vector<4x64xf32> -> vector<4x64xf32>
    %7 = arith.addf %4, %6 : vector<4x64xf32>
    %8 = vector.extract_strided_slice %2 {offsets = [0, 0], sizes = [1, 64], strides = [1, 1]} : vector<4x64xf32> to vector<1x64xf32>
    %9 = vector.broadcast %8 : vector<1x64xf32> to vector<4x64xf32>
    %10 = arith.addf %7, %9 : vector<4x64xf32>
    %cst_9 = arith.constant 0.000000e+00 : f32
    %11 = vector.broadcast %cst_9 : f32 to vector<4x64xf32>
    %12 = arith.maximumf %10, %11 : vector<4x64xf32>
    %c32 = arith.constant 32 : index
    %c0_10 = arith.constant 0 : index
    %13 = vector.load %arg2[%c32, %c0_10] : memref<224x64xf32, #tpu.memory_space<vmem>>, vector<64x64xf32>
    %cst_11 = arith.constant dense<0.000000e+00> : vector<4x64xf32>
    %14 = tpu.matmul %12, %13, %cst_11 {dimension_numbers = #tpu.dot_dimension_numbers<[1], [0], [0], [1], [0, 0, 1, 1], [], []>} : vector<4x64xf32>, vector<64x64xf32>, vector<4x64xf32> -> vector<4x64xf32>
    %15 = vector.extract_strided_slice %2 {offsets = [1, 0], sizes = [1, 64], strides = [1, 1]} : vector<4x64xf32> to vector<1x64xf32>
    %16 = vector.broadcast %15 : vector<1x64xf32> to vector<4x64xf32>
    %17 = arith.addf %14, %16 : vector<4x64xf32>
    %cst_12 = arith.constant 0.000000e+00 : f32
    %18 = vector.broadcast %cst_12 : f32 to vector<4x64xf32>
    %19 = arith.maximumf %17, %18 : vector<4x64xf32>
    %c96 = arith.constant 96 : index
    %c0_13 = arith.constant 0 : index
    %20 = vector.load %arg2[%c96, %c0_13] : memref<224x64xf32, #tpu.memory_space<vmem>>, vector<64x64xf32>
    %cst_14 = arith.constant dense<0.000000e+00> : vector<4x64xf32>
    %21 = tpu.matmul %19, %20, %cst_14 {dimension_numbers = #tpu.dot_dimension_numbers<[1], [0], [0], [1], [0, 0, 1, 1], [], []>} : vector<4x64xf32>, vector<64x64xf32>, vector<4x64xf32> -> vector<4x64xf32>
    %22 = vector.extract_strided_slice %2 {offsets = [2, 0], sizes = [1, 64], strides = [1, 1]} : vector<4x64xf32> to vector<1x64xf32>
    %23 = vector.broadcast %22 : vector<1x64xf32> to vector<4x64xf32>
    %24 = arith.addf %21, %23 : vector<4x64xf32>
    %cst_15 = arith.constant 0.000000e+00 : f32
    %25 = vector.broadcast %cst_15 : f32 to vector<4x64xf32>
    %26 = arith.maximumf %24, %25 : vector<4x64xf32>
    %c160 = arith.constant 160 : index
    %c0_16 = arith.constant 0 : index
    %27 = vector.load %arg2[%c160, %c0_16] : memref<224x64xf32, #tpu.memory_space<vmem>>, vector<64x64xf32>
    %cst_17 = arith.constant dense<0.000000e+00> : vector<4x64xf32>
    %28 = tpu.matmul %26, %27, %cst_17 {dimension_numbers = #tpu.dot_dimension_numbers<[1], [0], [0], [1], [0, 0, 1, 1], [], []>} : vector<4x64xf32>, vector<64x64xf32>, vector<4x64xf32> -> vector<4x64xf32>
    %29 = vector.extract_strided_slice %2 {offsets = [3, 0], sizes = [1, 64], strides = [1, 1]} : vector<4x64xf32> to vector<1x64xf32>
    %30 = vector.broadcast %29 : vector<1x64xf32> to vector<4x64xf32>
    %31 = arith.addf %28, %30 : vector<4x64xf32>
    %32 = vector.extract_strided_slice %31 {offsets = [0, 0], sizes = [4, 2], strides = [1, 1]} : vector<4x64xf32> to vector<4x2xf32>
    %c0_18 = arith.constant 0 : index
    %c0_19 = arith.constant 0 : index
    %33 = vector.load %arg4[%c0_18, %c0_19] : memref<4x2xf32, #tpu.memory_space<vmem>>, vector<4x2xf32>
    tpu.vector_store %arg4[%c0_18, %c0_19], %32 {strides = array<i32>} : memref<4x2xf32, #tpu.memory_space<vmem>>, vector<4x2xf32>,
    return
  }
}

</mosaic_0001>

<bundles_post_ra>
// kernel: tpu_custom_call.1
= control target key start
LH: loop header
LB: loop body
LE: loop exit
PB: predicated region body
PF: predicated region fallthrough
CT: control target
= control target key end

     0   :  { %vm24_vm0 = vcmask 64512   ;;  %v553_v0 = vmov 0.0   ;;  %vm554_vm1 = vmmov 0   ;;  %vm98_vm2 = vcmask 195584   ;;  %s717_s2 = inlined_call_operand.vmem [shape: f32[224,64], index: 2, kind: input, shape index: {}]   ;;  %s718_s1 = inlined_call_operand.vmem [shape: f32[4,8], index: 1, kind: input, shape index: {}]   ;;  %s719_s0 = inlined_call_operand.vmem [shape: f32[4,24], index: 0, kind: input, shape index: {}]   ;;  %s720_s3 = inlined_call_operand.vmem [shape: f32[4,64], index: 3, kind: input, shape index: {}]   ;;  %s721_s4 = inlined_call_operand.vmem [shape: f32[4,2], index: 4, kind: output, shape index: {}]  }
   0x1   :  { %480 = vmatprep.subr.mxu1 %v553_v0  ;;  %v23_v1 = vld [vmem:[%s717_s2 + $0x18] sm:$0xff]  ;;  %482 = vmatprep.mubr.msk.f32.mxu1 %vm554_vm1, %v553_v0  ;;  %v18_v2 = vld [vmem:[%s718_s1] sm:$0xf]  ;;  %v22_v3 = vld [vmem:[%s717_s2 + $0x10] sm:$0xff]  ;;  %v172_v20 = vlaneseq  ;;  %vm190_vm3 = vcmask 523264   ;;  %vm436_vm4 = vcmask 11264  }
   0x2   :  { %481 = vmatpush3.msra.mxu1 %v23_v1  ;;  %494 = vmatprep.subr.mxu0 %v553_v0  ;;  %v21_v4 = vld [vmem:[%s717_s2 + $0x8] sm:$0xff]  ;;  %v185_v5 = vld [vmem:[%s717_s2 + $0x58] sm:$0xff]  ;;  %v20_v6 = vld [vmem:[%s717_s2] sm:$0xff] }
   0x3   :  { %483 = vmatmul.mubr.msk.f32.vlgmr.msra.gmra.mxu1 %vm24_vm0, %v18_v2  ;;  %485 = vmatprep.subr.mxu1 %v553_v0  ;;  %v17_v7 = vld [vmem:[%s719_s0] sm:$0xf]  ;;  %v184_v8 = vld [vmem:[%s717_s2 + $0x50] sm:$0xff]  ;;  %v183_v9 = vld [vmem:[%s717_s2 + $0x48] sm:$0xff]  ;;  %v173_v21 = vshrl.u32 %v172_v20, 7 }
   0x4   :  { %486 = vmatpush3.msra.mxu1 %v22_v3  ;;  %491 = vmatprep.mubr.msk.f32.mxu1 %vm554_vm1, %v553_v0  ;;  %v182_v10 = vld [vmem:[%s717_s2 + $0x40] sm:$0xff]  ;;  %v181_v11 = vld [vmem:[%s717_s2 + $0x38] sm:$0xff]  ;;  %v180_v12 = vld [vmem:[%s717_s2 + $0x30] sm:$0xff] }
   0x5   :  { %487 = vmatprep.subr.mxu1 %v553_v0  ;;  %495 = vmatpush3.msra.mxu0 %v185_v5  ;;  %v179_v13 = vld [vmem:[%s717_s2 + $0x28] sm:$0xff]  ;;  %v178_v14 = vld [vmem:[%s717_s2 + $0x20] sm:$0xff]  ;;  %v272_v15 = vld [vmem:[%s717_s2 + $0x98] sm:$0xff]  ;;  %v174_v23 = vsub.s32 0, %v173_v21  ;;  %v188_v40 = vsub.s32 1, %v173_v21  ;;  %v275_v49 = vsub.s32 2, %v173_v21 }
   0x6   :  { %488 = vmatpush3.msra.mxu1 %v21_v4  ;;  %496 = vmatprep.subr.mxu0 %v553_v0  ;;  %v271_v16 = vld [vmem:[%s717_s2 + $0x90] sm:$0xff]  ;;  %v270_v17 = vld [vmem:[%s717_s2 + $0x88] sm:$0xff]  ;;  %v269_v18 = vld [vmem:[%s717_s2 + $0x80] sm:$0xff]  ;;  %v361_v55 = vsub.s32 3, %v173_v21 }
   0x7   :  { %489 = vmatprep.subr.mxu1 %v553_v0  ;;  %510 = vmatprep.mubr.msk.f32.mxu0 %vm554_vm1, %v553_v0  ;;  %v268_v19 = vld [vmem:[%s717_s2 + $0x78] sm:$0xff]  ;;  %v19_v25 = vld [vmem:[%s720_s3] sm:$0xf]  ;;  %v267_v32 = vld [vmem:[%s717_s2 + $0x70] sm:$0xff] }
   0x8   :  { %490 = vmatpush3.msra.mxu1 %v20_v6  ;;  %497 = vmatpush3.msra.mxu0 %v184_v8  ;;  %v175_v26 = vrot.slane %v19_v25, %v174_v23  ;;  %v266_v33 = vld [vmem:[%s717_s2 + $0x68] sm:$0xff]  ;;  %v265_v34 = vld [vmem:[%s717_s2 + $0x60] sm:$0xff]  ;;  %v358_v35 = vld [vmem:[%s717_s2 + $0xd8] sm:$0xff]  ;;  %v189_v41 = vrot.slane %v19_v25, %v188_v40  ;;  %v276_v50 = vrot.slane %v19_v25, %v275_v49 }
   0x9   :  { %492 = vmatmul.mubr.msk.f32.vlgmr.msra.gmra.mxu1 %vm98_vm2, %v17_v7  ;;  %513 = vmatprep.subr.mxu1 %v553_v0  ;;  %v357_v36 = vld [vmem:[%s717_s2 + $0xd0] sm:$0xff]  ;;  %v356_v37 = vld [vmem:[%s717_s2 + $0xc8] sm:$0xff]  ;;  %v355_v38 = vld [vmem:[%s717_s2 + $0xc0] sm:$0xff]  ;;  %v362_v56 = vrot.slane %v19_v25, %v361_v55 }
   0xa   :  { %529 = vmatprep.mubr.msk.f32.mxu1 %vm554_vm1, %v553_v0  ;;  %498 = vmatprep.subr.mxu0 %v553_v0  ;;  %v354_v39 = vld [vmem:[%s717_s2 + $0xb8] sm:$0xff]  ;;  %v353_v46 = vld [vmem:[%s717_s2 + $0xb0] sm:$0xff]  ;;  %v352_v47 = vld [vmem:[%s717_s2 + $0xa8] sm:$0xff] }
   0xb   :  { %499 = vmatpush3.msra.mxu0 %v183_v9  ;;  %514 = vmatpush3.msra.mxu1 %v272_v15  ;;  %v351_v48 = vld [vmem:[%s717_s2 + $0xa0] sm:$0xff] }
   0xc   :  { %500 = vmatprep.subr.mxu0 %v553_v0  ;;  %515 = vmatprep.subr.mxu1 %v553_v0 }
   0xd   :  { %501 = vmatpush3.msra.mxu0 %v182_v10  ;;  %516 = vmatpush3.msra.mxu1 %v271_v16 }
   0xe   :  { %502 = vmatprep.subr.mxu0 %v553_v0  ;;  %517 = vmatprep.subr.mxu1 %v553_v0 }
   0xf   :  { %503 = vmatpush3.msra.mxu0 %v181_v11  ;;  %518 = vmatpush3.msra.mxu1 %v270_v17 }
  0x10   :  { %504 = vmatprep.subr.mxu0 %v553_v0  ;;  %519 = vmatprep.subr.mxu1 %v553_v0 }
  0x11   :  { %505 = vmatpush3.msra.mxu0 %v180_v12  ;;  %520 = vmatpush3.msra.mxu1 %v269_v18 }
  0x12   :  { %506 = vmatprep.subr.mxu0 %v553_v0  ;;  %521 = vmatprep.subr.mxu1 %v553_v0 }
  0x13   :  { %507 = vmatpush3.msra.mxu0 %v179_v13  ;;  %522 = vmatpush3.msra.mxu1 %v268_v19 }
  0x14   :  { %508 = vmatprep.subr.mxu0 %v553_v0  ;;  %523 = vmatprep.subr.mxu1 %v553_v0 }
  0x15   :  { %509 = vmatpush3.msra.mxu0 %v178_v14  ;;  %524 = vmatpush3.msra.mxu1 %v267_v32 }
  0x16   :  { %532 = vmatprep.subr.mxu0 %v553_v0  ;;  %525 = vmatprep.subr.mxu1 %v553_v0 }
  0x17   :  { %526 = vmatpush3.msra.mxu1 %v266_v33 }
  0x18   :  { %527 = vmatprep.subr.mxu1 %v553_v0 }
  0x19   :  { %528 = vmatpush3.msra.mxu1 %v265_v34 }
  0xc3   :  { %v94_v22 = vpop.f32.mrf.mxu1 }
  0xc5   :  { %v484_v24 = vpop.f32.mrf.mxu1 }
  0xc9   :  { %v168_v27 = vpop.f32.mrf.mxu1 }
  0xca   :  { %v169_v28 = vadd.f32 %v168_v27, %v94_v22 }
  0xcb   :  { %v493_v29 = vpop.f32.mrf.mxu1 }
  0xcc   :  { %v176_v30 = vadd.f32 %v175_v26, %v169_v28 }
  0xce   :  { %v177_v31 = vmax.f32 %v176_v30, 0.0 }
  0xd0   :  { %511 = vmatmul.mubr.msk.f32.vlgmr.msra.gmra.mxu0 %vm190_vm3, %v177_v31 }
  0xd1   :  { %548 = vmatprep.mubr.msk.f32.mxu0 %vm554_vm1, %v553_v0  ;;  %533 = vmatpush3.msra.mxu0 %v358_v35 }
  0xd2   :  { %534 = vmatprep.subr.mxu0 %v553_v0 }
  0xd3   :  { %535 = vmatpush3.msra.mxu0 %v357_v36 }
  0xd4   :  { %536 = vmatprep.subr.mxu0 %v553_v0 }
  0xd5   :  { %537 = vmatpush3.msra.mxu0 %v356_v37 }
  0xd6   :  { %538 = vmatprep.subr.mxu0 %v553_v0 }
  0xd7   :  { %539 = vmatpush3.msra.mxu0 %v355_v38 }
  0xd8   :  { %540 = vmatprep.subr.mxu0 %v553_v0 }
  0xd9   :  { %541 = vmatpush3.msra.mxu0 %v354_v39 }
  0xda   :  { %542 = vmatprep.subr.mxu0 %v553_v0 }
  0xdb   :  { %543 = vmatpush3.msra.mxu0 %v353_v46 }
  0xdc   :  { %544 = vmatprep.subr.mxu0 %v553_v0 }
  0xdd   :  { %545 = vmatpush3.msra.mxu0 %v352_v47 }
  0xde   :  { %546 = vmatprep.subr.mxu0 %v553_v0 }
  0xdf   :  { %547 = vmatpush3.msra.mxu0 %v351_v48 }
 0x190   :  { %v260_v42 = vpop.f32.mrf.mxu0 }
 0x191   :  { %v261_v43 = vadd.f32 %v260_v42, %v189_v41 }
 0x192   :  { %v512_v44 = vpop.f32.mrf.mxu0 }
 0x193   :  { %v264_v45 = vmax.f32 %v261_v43, 0.0 }
 0x195   :  { %530 = vmatmul.mubr.msk.f32.vlgmr.msra.gmra.mxu1 %vm190_vm3, %v264_v45 }
 0x255   :  { %v346_v51 = vpop.f32.mrf.mxu1 }
 0x256   :  { %v347_v52 = vadd.f32 %v346_v51, %v276_v50 }
 0x257   :  { %v531_v53 = vpop.f32.mrf.mxu1 }
 0x258   :  { %v350_v54 = vmax.f32 %v347_v52, 0.0 }
 0x25a   :  { %549 = vmatmul.mubr.msk.f32.vlgmr.msra.gmra.mxu0 %vm190_vm3, %v350_v54 }
 0x31a   :  { %v432_v57 = vpop.f32.mrf.mxu0 }
 0x31b   :  { %v433_v58 = vadd.f32 %v432_v57, %v362_v56 }
 0x31c   :  { %v550_v59 = vpop.f32.mrf.mxu0 }
 0x31d   :  { %437 = vst.msk [vmem:[%s721_s4] sm:$0xf] %vm436_vm4, %v433_v58 }

</bundles_post_ra>
